<compile_context>
chip_gen: v5e
topology: v5e:2x2
jax: 0.10.0
libtpu: 0.0.40
codegen_flags: <defaults>
</compile_context>

<pallas_src>
import jax
import jax.numpy as jnp
from jax.experimental import pallas as pl
from jax.experimental.pallas import tpu as pltpu


def _channel_attention_kernel(x_ref, w1_ref, w2t_ref, o_ref):
    # x_ref: (Bt, C, HW)   w1_ref: (C_red, C)   w2t_ref: (C_red, C)
    Bt, C, HW = x_ref.shape

    x = x_ref[...]                                      # native dtype, (Bt, C, HW)

    # Global pooling over the spatial (lane) axis.  f32 accumulation for the
    # mean without materializing a full-tile f32 copy; tail lanes (HW not a
    # multiple of 128) are masked by Mosaic since HW is the logical extent.
    avg = jnp.sum(x, axis=-1, dtype=jnp.float32) * (1.0 / float(HW))   # (Bt, C)
    mx = jnp.max(x, axis=-1).astype(jnp.float32)                       # (Bt, C)

    # Shared MLP applied to avg and max pooled vectors at once:
    # one MXU dot per layer instead of two.
    pooled = jnp.concatenate([avg, mx], axis=0)                        # (2*Bt, C)
    w1 = w1_ref[...].astype(jnp.float32)                               # (C_red, C)
    w2t = w2t_ref[...].astype(jnp.float32)                             # (C_red, C)

    h = jax.lax.dot_general(                                           # pooled @ w1.T
        pooled, w1, (((1,), (1,)), ((), ())),
        preferred_element_type=jnp.float32)                            # (2*Bt, C_red)
    h = jnp.maximum(h, 0.0)
    out = jax.lax.dot_general(                                         # h @ w2.T
        h, w2t, (((1,), (0,)), ((), ())),
        preferred_element_type=jnp.float32)                            # (2*Bt, C)

    scale = jax.nn.sigmoid(out[:Bt] + out[Bt:])                        # (Bt, C) f32
    scale = scale.astype(o_ref.dtype)

    # Elementwise scale at native dtype; re-read x_ref so the full tile is not
    # held live (in vregs) between the pooling and the final multiply.
    o_ref[...] = (x_ref[...] * scale[:, :, None]).astype(o_ref.dtype)


def _round_up(n, m):
    return ((n + m - 1) // m) * m


def _tpu_defaults():
    """(target_block_bytes, vmem_limit_bytes, num_tensorcores) per generation."""
    vmem_cap = 64 * 1024 * 1024                     # conservative fallback (v7x)
    try:
        vmem_cap = int(pltpu.get_tpu_info().vmem_capacity_bytes)
    except Exception:
        pass
    num_tc = 1
    try:
        if "v7" in jax.devices()[0].device_kind.lower():
            num_tc = 2
    except Exception:
        pass
    if vmem_cap >= 100 * 1024 * 1024:
        # v5e / v6e: single TC, 128 MiB VMEM -> bigger blocks, higher limit.
        return 12 * 1024 * 1024, 96 * 1024 * 1024, num_tc
    # v7x (64 MiB VMEM) or unknown: modest blocks, <= ~48 MiB scoped VMEM.
    return 4 * 1024 * 1024, 48 * 1024 * 1024, num_tc


def _choose_batch_tile(B, bytes_per_image, target_block_bytes, num_tc):
    """Largest Bt dividing B with block <= target; on multi-TC chips prefer a
    grid step count that is a multiple of the core count (load balance)."""
    fits = [bt for bt in range(1, B + 1)
            if B % bt == 0 and bt * bytes_per_image <= target_block_bytes]
    if not fits:
        return 1
    if num_tc > 1:
        balanced = [bt for bt in fits if (B // bt) % num_tc == 0]
        if balanced:
            return max(balanced)
    return max(fits)


def channel_attention(x, w1, w2, *, target_block_bytes=None, vmem_limit_bytes=None):
    """x: (B, C, H, W); w1: (C//r, C); w2: (C, C//r).

    Computes sigmoid(MLP(avg_pool(x)) + MLP(max_pool(x))) * x.
    """
    B, C, H, W = x.shape
    HW = H * W
    C_red = w1.shape[0]

    x_flat = x.reshape(B, C, HW)
    w2t = jnp.transpose(w2)                           # (C_red, C), lane-dense

    tb_default, vmem_default, num_tc = _tpu_defaults()
    if target_block_bytes is None:
        target_block_bytes = tb_default
    if vmem_limit_bytes is None:
        vmem_limit_bytes = vmem_default

    # VMEM footprint of one image after Mosaic's (8, 128) layout rounding.
    bytes_per_image = _round_up(C, 8) * _round_up(HW, 128) * x.dtype.itemsize
    Bt = _choose_batch_tile(B, bytes_per_image, target_block_bytes, num_tc)
    grid = (B // Bt,)

    itemsize = x.dtype.itemsize
    cost = pl.CostEstimate(
        flops=2 * B * C * HW + 8 * B * C * C_red,
        bytes_accessed=2 * B * C * HW * itemsize
        + (w1.size + w2.size) * w1.dtype.itemsize,
        transcendentals=B * C,
    )

    out_flat = pl.pallas_call(
        _channel_attention_kernel,
        out_shape=jax.ShapeDtypeStruct((B, C, HW), x.dtype),
        grid_spec=pltpu.PrefetchScalarGridSpec(
            num_scalar_prefetch=0,
            grid=grid,
            in_specs=[
                pl.BlockSpec((Bt, C, HW), lambda b: (b, 0, 0)),
                pl.BlockSpec(w1.shape, lambda b: (0, 0)),
                pl.BlockSpec(w2t.shape, lambda b: (0, 0)),
            ],
            out_specs=pl.BlockSpec((Bt, C, HW), lambda b: (b, 0, 0)),
        ),
        compiler_params=pltpu.CompilerParams(
            dimension_semantics=("parallel",),
            vmem_limit_bytes=vmem_limit_bytes),
        cost_estimate=cost,
    )(x_flat, w1, w2t)

    return out_flat.reshape(B, C, H, W)


def _reference(x, w1, w2):
    # Pure-JAX (f32) reference of the PyTorch forward for sanity checking.
    xf = x.astype(jnp.float32)
    w1f = w1.astype(jnp.float32)
    w2f = w2.astype(jnp.float32)
    avg = jnp.mean(xf, axis=(2, 3))                   # (B, C)
    mx = jnp.max(xf, axis=(2, 3))                     # (B, C)

    def fc(v):                                        # v: (B, C)
        h = jnp.maximum(v @ w1f.T, 0.0)               # (B, C_red)
        return h @ w2f.T                              # (B, C)

    scale = jax.nn.sigmoid(fc(avg) + fc(mx))          # (B, C)
    return xf * scale[:, :, None, None]


if __name__ == "__main__":
    def _run_case(B, C, H, W, reduction, key, dtype, atol, rtol):
        C_red = max(1, C // reduction)
        kx, k1, k2 = jax.random.split(key, 3)
        x = jax.random.normal(kx, (B, C, H, W), dtype=jnp.float32).astype(dtype)
        # Conv2d(C, C_red, 1, bias=False) weight -> (C_red, C) after squeezing 1x1
        w1 = jax.random.normal(k1, (C_red, C), dtype=jnp.float32) * 0.1
        # Conv2d(C_red, C, 1, bias=False) weight -> (C, C_red)
        w2 = jax.random.normal(k2, (C, C_red), dtype=jnp.float32) * 0.1

        out = jax.block_until_ready(channel_attention(x, w1, w2))
        ref = _reference(x, w1, w2)
        assert out.shape == (B, C, H, W)
        assert jnp.allclose(out.astype(jnp.float32), ref, atol=atol, rtol=rtol), (
            f"mismatch vs reference for case {(B, C, H, W, reduction, dtype)}")

    root = jax.random.PRNGKey(0)
    ka, kb, kc = jax.random.split(root, 3)
    # Lane-dense case: HW = 256 (multiple of 128), f32.
    _run_case(2, 64, 16, 16, 16, ka, jnp.float32, 1e-5, 1e-5)
    # Ragged spatial dim: HW = 100 (tail lanes masked by Mosaic), batched, f32.
    _run_case(4, 32, 10, 10, 8, kb, jnp.float32, 1e-5, 1e-5)
    # bf16 I/O (the ~2x-bandwidth path), ragged HW = 144.
    _run_case(2, 64, 12, 12, 16, kc, jnp.bfloat16, 5e-2, 5e-2)

    print("KERNEL_OK")
</pallas_src>

<mosaic_0001>
module attributes {stable_mosaic.version = 11 : i64} {
  func.func @_channel_attention_kernel(%arg0: i32, %arg1: memref<2x64x256xf32, #tpu.memory_space<vmem>>, %arg2: memref<4x64xf32, #tpu.memory_space<vmem>>, %arg3: memref<4x64xf32, #tpu.memory_space<vmem>>, %arg4: memref<2x64x256xf32, #tpu.memory_space<vmem>>) attributes {dimension_semantics = [#tpu.dimension_semantics<parallel>], iteration_bounds = array<i64: 1>, scalar_prefetch = 0 : i64, scratch_operands = 0 : i64, tpu.core_type = #tpu.core_type<tc>, window_params = [{transform_indices = @transform_0, window_bounds = array<i64: 2, 64, 256>}, {pipeline_mode = #tpu.pipeline_mode<synchronous>, transform_indices = @transform_1, window_bounds = array<i64: 4, 64>}, {pipeline_mode = #tpu.pipeline_mode<synchronous>, transform_indices = @transform_2, window_bounds = array<i64: 4, 64>}, {transform_indices = @transform_3, window_bounds = array<i64: 2, 64, 256>}]} {
    %c0 = arith.constant 0 : index
    %c0_0 = arith.constant 0 : index
    %c0_1 = arith.constant 0 : index
    %0 = vector.load %arg1[%c0, %c0_0, %c0_1] : memref<2x64x256xf32, #tpu.memory_space<vmem>>, vector<2x64x256xf32>
    %cst = arith.constant dense<0.000000e+00> : vector<2x64xf32>
    %1 = vector.multi_reduction <add>, %0, %cst [2] : vector<2x64x256xf32> to vector<2x64xf32>
    %cst_2 = arith.constant 3.906250e-03 : f32
    %2 = vector.broadcast %cst_2 : f32 to vector<2x64xf32>
    %3 = arith.mulf %1, %2 : vector<2x64xf32>
    %cst_3 = arith.constant dense<0xFF800000> : vector<2x64xf32>
    %4 = vector.multi_reduction <maximumf>, %0, %cst_3 [2] : vector<2x64x256xf32> to vector<2x64xf32>
    %5 = tpu.concatenate %3, %4 in 0 : vector<2x64xf32>, vector<2x64xf32> -> vector<4x64xf32>
    %c0_4 = arith.constant 0 : index
    %c0_5 = arith.constant 0 : index
    %6 = vector.load %arg2[%c0_4, %c0_5] : memref<4x64xf32, #tpu.memory_space<vmem>>, vector<4x64xf32>
    %c0_6 = arith.constant 0 : index
    %c0_7 = arith.constant 0 : index
    %7 = vector.load %arg3[%c0_6, %c0_7] : memref<4x64xf32, #tpu.memory_space<vmem>>, vector<4x64xf32>
    %cst_8 = arith.constant dense<0.000000e+00> : vector<4x4xf32>
    %8 = tpu.matmul %5, %6, %cst_8 {dimension_numbers = #tpu.dot_dimension_numbers<[1], [1], [0], [0], [0, 0, 1, 0], [], []>} : vector<4x64xf32>, vector<4x64xf32>, vector<4x4xf32> -> vector<4x4xf32>
    %cst_9 = arith.constant 0.000000e+00 : f32
    %9 = vector.broadcast %cst_9 : f32 to vector<4x4xf32>
    %10 = arith.maximumf %8, %9 : vector<4x4xf32>
    %cst_10 = arith.constant dense<0.000000e+00> : vector<4x64xf32>
    %11 = tpu.matmul %10, %7, %cst_10 {dimension_numbers = #tpu.dot_dimension_numbers<[1], [0], [0], [1], [0, 0, 1, 1], [], []>} : vector<4x4xf32>, vector<4x64xf32>, vector<4x64xf32> -> vector<4x64xf32>
    %12 = vector.extract_strided_slice %11 {offsets = [0, 0], sizes = [2, 64], strides = [1, 1]} : vector<4x64xf32> to vector<2x64xf32>
    %13 = vector.extract_strided_slice %11 {offsets = [2, 0], sizes = [2, 64], strides = [1, 1]} : vector<4x64xf32> to vector<2x64xf32>
    %14 = arith.addf %12, %13 : vector<2x64xf32>
    %15 = arith.negf %14 : vector<2x64xf32>
    %16 = math.exp %15 : vector<2x64xf32>
    %cst_11 = arith.constant 1.000000e+00 : f32
    %17 = vector.broadcast %cst_11 : f32 to vector<2x64xf32>
    %18 = arith.addf %17, %16 : vector<2x64xf32>
    %19 = arith.divf %17, %18 : vector<2x64xf32>
    %c0_12 = arith.constant 0 : index
    %c0_13 = arith.constant 0 : index
    %c0_14 = arith.constant 0 : index
    %20 = vector.load %arg1[%c0_12, %c0_13, %c0_14] : memref<2x64x256xf32, #tpu.memory_space<vmem>>, vector<2x64x256xf32>
    %21 = vector.shape_cast %19 : vector<2x64xf32> to vector<2x64x1xf32>
    %22 = vector.broadcast %21 : vector<2x64x1xf32> to vector<2x64x256xf32>
    %23 = arith.mulf %20, %22 : vector<2x64x256xf32>
    %c0_15 = arith.constant 0 : index
    %c0_16 = arith.constant 0 : index
    %c0_17 = arith.constant 0 : index
    %24 = vector.load %arg4[%c0_15, %c0_16, %c0_17] : memref<2x64x256xf32, #tpu.memory_space<vmem>>, vector<2x64x256xf32>
    tpu.vector_store %arg4[%c0_15, %c0_16, %c0_17], %23 {strides = array<i32>} : memref<2x64x256xf32, #tpu.memory_space<vmem>>, vector<2x64x256xf32>,
    return
  }
  func.func @transform_0(%arg0: i32) -> (i32, i32, i32) {
    %c0_i32 = arith.constant 0 : i32
    %c0_i32_0 = arith.constant 0 : i32
    %c0_i32_1 = arith.constant 0 : i32
    return %arg0, %c0_i32, %c0_i32_0 : i32, i32, i32
  }
  func.func @transform_1(%arg0: i32) -> (i32, i32) {
    %c0_i32 = arith.constant 0 : i32
    %c0_i32_0 = arith.constant 0 : i32
    %c0_i32_1 = arith.constant 0 : i32
    return %c0_i32, %c0_i32_0 : i32, i32
  }
  func.func @transform_2(%arg0: i32) -> (i32, i32) {
    %c0_i32 = arith.constant 0 : i32
    %c0_i32_0 = arith.constant 0 : i32
    %c0_i32_1 = arith.constant 0 : i32
    return %c0_i32, %c0_i32_0 : i32, i32
  }
  func.func @transform_3(%arg0: i32) -> (i32, i32, i32) {
    %c0_i32 = arith.constant 0 : i32
    %c0_i32_0 = arith.constant 0 : i32
    %c0_i32_1 = arith.constant 0 : i32
    return %arg0, %c0_i32, %c0_i32_0 : i32, i32, i32
  }
}

</mosaic_0001>

<bundles_post_ra>
// kernel: tpu_custom_call.1
= control target key start
LH: loop header
LB: loop body
LE: loop exit
PB: predicated region body
PF: predicated region fallthrough
CT: control target
= control target key end

     0   :  { %8 = vsyncpa [#allocation3], 0  ;;  %s1036_s0 = inlined_call_operand.hbm [shape: f32[2,64,256], index: 0, kind: input, shape index: {}]   ;;  %s1037_s1 = inlined_call_operand.hbm [shape: f32[4,64], index: 1, kind: input, shape index: {}]   ;;  %s1038_s2 = inlined_call_operand.hbm [shape: f32[4,64], index: 2, kind: input, shape index: {}]   ;;  %s1039_s3 = inlined_call_operand.hbm [shape: f32[2,64,256], index: 3, kind: output, shape index: {}]  }
   0x1   :  { %9 = vsyncpa [#allocation6], 0  ;;  %s29_s14 = sshll.u32 %s1037_s1, 4  ;;  %s30_s14 = int_to_ptr.hbm [resolvable:$true] %s29_s14 }
   0x2   :  { %10 = vsyncpa [#allocation4], 0  ;;  %s715_s15 = smov [#allocation5]   ;;  %s15_s19 = sshll.u32 %s1036_s0, 4  ;;  %s16_s19 = int_to_ptr.hbm [resolvable:$true] %s15_s19 }
   0x3   :  { %s31_s16 = sshll.u32 %s715_s15, 4  ;;  %s716_s20 = smov [#allocation2]   ;;  %s32_s16 = int_to_ptr.vmem [resolvable:$true] %s31_s16 }
   0x4   :  { %34 = dma.hbm_to_vmem [thread:$0]  %s30_s14, 64, %s32_s16, [#allocation6]  }
   0x5   :  { %s17_s21 = sshll.u32 %s716_s20, 4  ;;  %s717_s22 = smov 256   ;;  %s18_s21 = int_to_ptr.vmem [resolvable:$true] %s17_s21 }
   0x6   :  { %s718_s23 = smov 16   ;;  %s40_s25 = sshll.u32 %s1038_s2, 4  ;;  %s41_s25 = int_to_ptr.hbm [resolvable:$true] %s40_s25 }
   0x7   :  { %23 = dma.hbm_to_vmem [thread:$0]  %s16_s19, 4096, %s18_s21, [#allocation3], %s717_s22, %s717_s22, %s718_s23  }
   0x8   :  { %s719_s26 = smov [#allocation7]  }
   0x9   :  { %s42_s27 = sshll.u32 %s719_s26, 4  ;;  %s43_s27 = int_to_ptr.vmem [resolvable:$true] %s42_s27 }
   0xa   :  { %45 = dma.hbm_to_vmem [thread:$0]  %s41_s25, 64, %s43_s27, [#allocation6]  }
   0xb   :  { %709 = dma.done.wait [#allocation3], 4096  }
   0xc   :  { %710 = vsyncadd [#allocation3], 4294963200 }
   0xd   :  { %711 = dma.done.wait [#allocation6], 128  }
   0xe   :  { %712 = vsyncadd [#allocation6], 4294967168  ;;  %v753_v0 = vld [vmem:[#allocation2 + $0x80] sm:$0xff]  ;;  %v755_v1 = vld [vmem:[#allocation2 + $0x88] sm:$0xff]  ;;  %vm223_vm0 = vcmask 130112   ;;  %vm227_vm1 = vcmask 195712  }
   0xf   :  { %v757_v2 = vld [vmem:[#allocation2 + $0x20] sm:$0xff]  ;;  %v114_v3 = vadd.f32 %v755_v1, %v753_v0  ;;  %v761_v4 = vld [vmem:[#allocation2 + $0x28] sm:$0xff]  ;;  %v771_v9 = vld [vmem:[#allocation2 + $0x90] sm:$0xff]  ;;  %v178_v25 = vmax.f32 %v753_v0, %v755_v1  ;;  %vm320_vm2 = vcmask 523264   ;;  %vm231_vm3 = vcmask 261312   ;;  %s720_s0 = smov [#allocation8]  }
  0x10   :  { %v763_v5 = vld [vmem:[#allocation2] sm:$0xff]  ;;  %v765_v6 = vld [vmem:[#allocation2 + $0x8] sm:$0xff]  ;;  %v96_v7 = vadd.f32 %v761_v4, %v757_v2  ;;  %v773_v10 = vld [vmem:[#allocation2 + $0x98] sm:$0xff]  ;;  %v160_v33 = vmax.f32 %v757_v2, %v761_v4  ;;  %vm235_vm4 = vcmask 326912   ;;  %vm239_vm5 = vcmask 392512   ;;  %s565_s2 = sshll.u32 %s720_s0, 4  ;;  %s566_s2 = int_to_ptr.vmem [resolvable:$true] %s565_s2 }
  0x11   :  { %v90_v8 = vadd.f32 %v765_v6, %v763_v5  ;;  %115 = vadd.xlane.f32.xlu1 %v114_v3  ;;  %v775_v11 = vld [vmem:[#allocation2 + $0xa0] sm:$0xff]  ;;  %v777_v12 = vld [vmem:[#allocation2 + $0xa8] sm:$0xff]  ;;  %v779_v13 = vld [vmem:[#allocation2 + $0x10] sm:$0xff]  ;;  %v117_v15 = vadd.f32 %v773_v10, %v771_v9  ;;  %v154_v23 = vmax.f32 %v763_v5, %v765_v6  ;;  %v181_v26 = vmax.f32 %v771_v9, %v773_v10  ;;  %s567_s30 = sshll.u32 %s1039_s3, 4  ;;  %s568_s30 = int_to_ptr.hbm [resolvable:$true] %s567_s30 }
  0x12   :  { %97 = vadd.xlane.f32.xlu2 %v96_v7  ;;  %1050 = vst [vmem:[#allocation12_spill] sm:$0xff] %v777_v12  ;;  %v781_v14 = vld [vmem:[#allocation2 + $0x18] sm:$0xff]  ;;  %v120_v16 = vadd.f32 %v777_v12, %v775_v11  ;;  %v789_v18 = vld [vmem:[#allocation2 + $0xb0] sm:$0xff]  ;;  %v809_v28 = vld [vmem:[#allocation2 + $0xc0] sm:$0xff]  ;;  %v184_v41 = vmax.f32 %v775_v11, %v777_v12  ;;  %v1040_v7 = vlaneseq  ;;  %vm243_vm6 = vcmask 458112  }
  0x13   :  { %91 = vadd.xlane.f32.xlu0 %v90_v8  ;;  %v93_v17 = vadd.f32 %v781_v14, %v779_v13  ;;  %1051 = vst [vmem:[#allocation13_spill] sm:$0xff] %v789_v18  ;;  %v791_v19 = vld [vmem:[#allocation2 + $0xb8] sm:$0xff]  ;;  %v793_v20 = vld [vmem:[#allocation2 + $0x30] sm:$0xff]  ;;  %v157_v27 = vmax.f32 %v779_v13, %v781_v14  ;;  %v811_v29 = vld [vmem:[#allocation2 + $0xc8] sm:$0xff]  ;;  %vm247_vm7 = vcmask 523712   ;;  %vm264_vm8 = vcmask 1041409  }
  0x14   :  { %1052 = vst [vmem:[#allocation14_spill] sm:$0xff] %v791_v19  ;;  %v795_v21 = vld [vmem:[#allocation2 + $0x38] sm:$0xff]  ;;  %v123_v22 = vadd.f32 %v791_v19, %v789_v18  ;;  %v813_v30 = vld [vmem:[#allocation2 + $0x40] sm:$0xff]  ;;  %v815_v31 = vld [vmem:[#allocation2 + $0x48] sm:$0xff]  ;;  %v126_v32 = vadd.f32 %v811_v29, %v809_v28  ;;  %v187_v44 = vmax.f32 %v789_v18, %v791_v19  ;;  %v190_v50 = vmax.f32 %v809_v28, %v811_v29 }
  0x15   :  { %v99_v24 = vadd.f32 %v795_v21, %v793_v20  ;;  %1053 = vst [vmem:[#allocation15_spill] sm:$0xff] %v809_v28  ;;  %v102_v34 = vadd.f32 %v815_v31, %v813_v30  ;;  %v823_v35 = vld [vmem:[#allocation2 + $0x50] sm:$0xff]  ;;  %v825_v36 = vld [vmem:[#allocation2 + $0x58] sm:$0xff]  ;;  %v837_v42 = vld [vmem:[#allocation2 + $0x60] sm:$0xff]  ;;  %v163_v46 = vmax.f32 %v793_v20, %v795_v21  ;;  %v166_v49 = vmax.f32 %v813_v30, %v815_v31 }
  0x16   :  { %1054 = vst [vmem:[#allocation16_spill] sm:$0xff] %v811_v29  ;;  %v827_v37 = vld [vmem:[#allocation2 + $0xd0] sm:$0xff]  ;;  %v829_v38 = vld [vmem:[#allocation2 + $0xd8] sm:$0xff]  ;;  %v105_v39 = vadd.f32 %v825_v36, %v823_v35  ;;  %v839_v43 = vld [vmem:[#allocation2 + $0x68] sm:$0xff]  ;;  %v169_v57 = vmax.f32 %v823_v35, %v825_v36  ;;  %vm313_vm9 = vcmask 1043459   ;;  %vm316_vm10 = vcmask 1041408  }
  0x17   :  { %v129_v40 = vadd.f32 %v829_v38, %v827_v37  ;;  %v108_v45 = vadd.f32 %v839_v43, %v837_v42  ;;  %v847_v47 = vld [vmem:[#allocation2 + $0xe0] sm:$0xff]  ;;  %v849_v48 = vld [vmem:[#allocation2 + $0xe8] sm:$0xff]  ;;  %v857_v52 = vld [vmem:[#allocation2 + $0xf0] sm:$0xff]  ;;  %v172_v59 = vmax.f32 %v837_v42, %v839_v43  ;;  %v193_v60 = vmax.f32 %v827_v37, %v829_v38 }
  0x18   :  { %1055 = vst [vmem:[#allocation17_spill] sm:$0xff] %v847_v47  ;;  %v132_v51 = vadd.f32 %v849_v48, %v847_v47  ;;  %v859_v53 = vld [vmem:[#allocation2 + $0xf8] sm:$0xff]  ;;  %v861_v54 = vld [vmem:[#allocation2 + $0x70] sm:$0xff]  ;;  %v196_v61 = vmax.f32 %v847_v47, %v849_v48  ;;  %vm352_vm11 = vcmask 1043456   ;;  %vm348_vm12 = vcmask 31744  }
  0x19   :  { %118 = vadd.xlane.f32.xlu1 %v117_v15  ;;  %1056 = vst [vmem:[#allocation18_spill] sm:$0xff] %v849_v48  ;;  %v863_v55 = vld [vmem:[#allocation2 + $0x78] sm:$0xff]  ;;  %v135_v56 = vadd.f32 %v859_v53, %v857_v52  ;;  %v199_v62 = vmax.f32 %v857_v52, %v859_v53 }
  0x1a   :  { %121 = vadd.xlane.f32.xlu2 %v120_v16  ;;  %1057 = vst [vmem:[#allocation19_spill] sm:$0xff] %v857_v52  ;;  %v111_v58 = vadd.f32 %v863_v55, %v861_v54  ;;  %v175_v63 = vmax.f32 %v861_v54, %v863_v55  ;;  %v882_v16 = vand.u32 127, %v1040_v7 }
  0x1b   :  { %94 = vadd.xlane.f32.xlu0 %v93_v17  ;;  %1058 = vst [vmem:[#allocation20_spill] sm:$0xff] %v859_v53 }
  0x1c   :  { %v926_v53 = vadd.s32 4294967256, %v882_v16 }
  0x21   :  { %124 = vadd.xlane.f32.xlu1 %v123_v22  ;;  %v885_v22 = vadd.s32 4294967288, %v882_v16 }
  0x22   :  { %155 = vmax.xlane.f32.xlu2 %v154_v23 }
  0x23   :  { %100 = vadd.xlane.f32.xlu0 %v99_v24 }
  0x29   :  { %179 = vmax.xlane.f32.xlu1 %v178_v25  ;;  %v888_v25 = vadd.s32 4294967280, %v882_v16 }
  0x2a   :  { %182 = vmax.xlane.f32.xlu2 %v181_v26 }
  0x2b   :  { %158 = vmax.xlane.f32.xlu0 %v157_v27 }
  0x31   :  { %127 = vadd.xlane.f32.xlu1 %v126_v32 }
  0x32   :  { %161 = vmax.xlane.f32.xlu2 %v160_v33 }
  0x33   :  { %103 = vadd.xlane.f32.xlu0 %v102_v34 }
  0x39   :  { %106 = vadd.xlane.f32.xlu1 %v105_v39 }
  0x3a   :  { %130 = vadd.xlane.f32.xlu2 %v129_v40 }
  0x3b   :  { %185 = vmax.xlane.f32.xlu0 %v184_v41 }
  0x41   :  { %188 = vmax.xlane.f32.xlu1 %v187_v44 }
  0x42   :  { %109 = vadd.xlane.f32.xlu2 %v108_v45 }
  0x43   :  { %164 = vmax.xlane.f32.xlu0 %v163_v46 }
  0x49   :  { %167 = vmax.xlane.f32.xlu1 %v166_v49 }
  0x4a   :  { %191 = vmax.xlane.f32.xlu2 %v190_v50 }
  0x4b   :  { %133 = vadd.xlane.f32.xlu0 %v132_v51 }
  0x51   :  { %136 = vadd.xlane.f32.xlu1 %v135_v56 }
  0x52   :  { %170 = vmax.xlane.f32.xlu2 %v169_v57 }
  0x53   :  { %112 = vadd.xlane.f32.xlu0 %v111_v58 }
  0x59   :  { %173 = vmax.xlane.f32.xlu1 %v172_v59 }
  0x5a   :  { %197 = vmax.xlane.f32.xlu2 %v196_v61 }
  0x5b   :  { %194 = vmax.xlane.f32.xlu0 %v193_v60 }
  0x61   :  { %200 = vmax.xlane.f32.xlu1 %v199_v62 }
  0x63   :  { %176 = vmax.xlane.f32.xlu0 %v175_v63 }
  0x84   :  { %v116_v3 = vpop.xlane.xlu1 %115 }
  0x85   :  { %v98_v8 = vpop.xlane.xlu2 %97  ;;  %v146_v17 = vmul.f32 0.00390625, %v116_v3 }
  0x86   :  { %v92_v15 = vpop.xlane.xlu0 %91  ;;  %v140_v26 = vmul.f32 0.00390625, %v98_v8 }
  0x87   :  { %v138_v23 = vmul.f32 0.00390625, %v92_v15  ;;  %v249_v39 = vperm.slane %v146_v17, %v882_v16 }
  0x88   :  { %v226_v45 = vperm.slane %v140_v26, %v888_v25  ;;  %v318_v26 = vld [vmem:[#allocation5] sm:$0xf] }
  0x89   :  { %v220_v41 = vperm.slane %v138_v23, %v882_v16  ;;  %581 = vmatpush.xpose.msk.msra.mxu0 %vm320_vm2, %v318_v26 }
  0x8c   :  { %v119_v24 = vpop.xlane.xlu1 %118 }
  0x8d   :  { %v147_v27 = vmul.f32 0.00390625, %v119_v24  ;;  %v122_v32 = vpop.xlane.xlu2 %121 }
  0x8e   :  { %v95_v33 = vpop.xlane.xlu0 %94 }
  0x8f   :  { %v139_v34 = vmul.f32 0.00390625, %v95_v33  ;;  %v250_v40 = vperm.slane %v147_v27, %v885_v22  ;;  %v148_v27 = vmul.f32 0.00390625, %v122_v32 }
  0x91   :  { %v222_v44 = vperm.slane %v139_v34, %v885_v22  ;;  %v251_v46 = vsel %vm223_vm0, %v250_v40, %v249_v39  ;;  %v918_v34 = vadd.s32 4294967272, %v882_v16  ;;  %v252_v32 = vperm.slane %v148_v27, %v888_v25 }
  0x92   :  { %v938_v27 = vadd.s32 4294967240, %v882_v16 }
  0x93   :  { %v224_v49 = vsel %vm223_vm0, %v222_v44, %v220_v41 }
  0x94   :  { %v228_v50 = vsel %vm227_vm1, %v226_v45, %v224_v49  ;;  %v125_v51 = vpop.xlane.xlu1 %124  ;;  %v923_v45 = vadd.s32 4294967264, %v882_v16 }
  0x95   :  { %v898_v56 = vpop.xlane.xlu2 %155  ;;  %v149_v39 = vmul.f32 0.00390625, %v125_v51  ;;  %v931_v51 = vadd.s32 4294967248, %v882_v16 }
  0x96   :  { %v101_v57 = vpop.xlane.xlu0 %100 }
  0x97   :  { %v141_v44 = vmul.f32 0.00390625, %v101_v57  ;;  %v254_v47 = vperm.slane %v149_v39, %v918_v34 }
  0x99   :  { %v230_v57 = vperm.slane %v141_v44, %v918_v34 }
  0x9c   :  { %v900_v58 = vpop.xlane.xlu1 %179 }
  0x9d   :  { %v902_v59 = vpop.xlane.xlu2 %182 }
  0x9e   :  { %v904_v60 = vpop.xlane.xlu0 %158 }
  0xa4   :  { %v128_v61 = vpop.xlane.xlu1 %127 }
  0xa5   :  { %v906_v62 = vpop.xlane.xlu2 %161  ;;  %v150_v49 = vmul.f32 0.00390625, %v128_v61 }
  0xa6   :  { %v104_v63 = vpop.xlane.xlu0 %103 }
  0xa7   :  { %v142_v7 = vmul.f32 0.00390625, %v104_v63  ;;  %v256_v61 = vperm.slane %v150_v49, %v923_v45 }
  0xa9   :  { %v234_v63 = vperm.slane %v142_v7, %v923_v45 }
  0xac   :  { %v107_v3 = vpop.xlane.xlu1 %106 }
  0xad   :  { %v131_v8 = vpop.xlane.xlu2 %130  ;;  %v143_v52 = vmul.f32 0.00390625, %v107_v3  ;;  %v253_v3 = vsel %vm227_vm1, %v252_v32, %v251_v46 }
  0xae   :  { %v908_v15 = vpop.xlane.xlu0 %185  ;;  %v151_v26 = vmul.f32 0.00390625, %v131_v8  ;;  %v255_v44 = vsel %vm231_vm3, %v254_v47, %v253_v3 }
  0xaf   :  { %v238_v39 = vperm.slane %v143_v52, %v926_v53  ;;  %v257_v18 = vsel %vm235_vm4, %v256_v61, %v255_v44  ;;  %v301_v61 = vperm.slane %v908_v15, %v888_v25 }
  0xb0   :  { %v258_v8 = vperm.slane %v151_v26, %v926_v53  ;;  %v232_v26 = vsel %vm231_vm3, %v230_v57, %v228_v50  ;;  %v298_v57 = vperm.slane %v900_v58, %v882_v16 }
  0xb1   :  { %v236_v46 = vsel %vm235_vm4, %v234_v63, %v232_v26 }
  0xb2   :  { %v259_v52 = vsel %vm239_vm5, %v258_v8, %v257_v18  ;;  %v240_v47 = vsel %vm239_vm5, %v238_v39, %v236_v46  ;;  %v299_v18 = vperm.slane %v902_v59, %v885_v22  ;;  %v283_v39 = vperm.slane %v898_v56, %v882_v16 }
  0xb4   :  { %v910_v17 = vpop.xlane.xlu1 %188  ;;  %v300_v59 = vsel %vm223_vm0, %v299_v18, %v298_v57 }
  0xb5   :  { %v110_v23 = vpop.xlane.xlu2 %109 }
  0xb6   :  { %v912_v24 = vpop.xlane.xlu0 %164  ;;  %v144_v29 = vmul.f32 0.00390625, %v110_v23 }
  0xb8   :  { %v242_v49 = vperm.slane %v144_v29, %v931_v51 }
  0xba   :  { %v244_v3 = vsel %vm243_vm6, %v242_v49, %v240_v47  ;;  %v288_v49 = vperm.slane %v912_v24, %v918_v34 }
  0xbc   :  { %v915_v33 = vpop.xlane.xlu1 %167 }
  0xbd   :  { %v920_v40 = vpop.xlane.xlu2 %191 }
  0xbe   :  { %v134_v41 = vpop.xlane.xlu0 %133  ;;  %v305_v58 = vperm.slane %v920_v40, %v923_v45 }
  0xbf   :  { %v152_v48 = vmul.f32 0.00390625, %v134_v41 }
  0xc1   :  { %v260_v23 = vperm.slane %v152_v48, %v931_v51 }
  0xc3   :  { %v261_v32 = vsel %vm243_vm6, %v260_v23, %v259_v52  ;;  %v284_v23 = vperm.slane %v904_v60, %v885_v22  ;;  %v290_v22 = vperm.slane %v915_v33, %v923_v45 }
  0xc4   :  { %v137_v41 = vpop.xlane.xlu1 %136 }
  0xc5   :  { %v153_v28 = vmul.f32 0.00390625, %v137_v41  ;;  %v171_v7 = vpop.xlane.xlu2 %170  ;;  %v286_v41 = vperm.slane %v906_v62, %v888_v25  ;;  %v285_v56 = vsel %vm223_vm0, %v284_v23, %v283_v39 }
  0xc6   :  { %v113_v19 = vpop.xlane.xlu0 %112  ;;  %v292_v40 = vperm.slane %v171_v7, %v926_v53 }
  0xc7   :  { %v145_v12 = vmul.f32 0.00390625, %v113_v19  ;;  %v262_v48 = vperm.slane %v153_v28, %v938_v27  ;;  %v287_v62 = vsel %vm227_vm1, %v286_v41, %v285_v56 }
  0xc8   :  { %v289_v24 = vsel %vm231_vm3, %v288_v49, %v287_v62 }
  0xc9   :  { %v246_v29 = vperm.slane %v145_v12, %v938_v27  ;;  %v263_v50 = vsel %vm247_vm7, %v262_v48, %v261_v32  ;;  %v303_v12 = vperm.slane %v910_v17, %v918_v34  ;;  %v302_v17 = vsel %vm227_vm1, %v301_v61, %v300_v59 }
  0xca   :  { %v291_v52 = vsel %vm235_vm4, %v290_v22, %v289_v24 }
  0xcb   :  { %v248_v19 = vsel %vm247_vm7, %v246_v29, %v244_v3  ;;  %v304_v16 = vsel %vm231_vm3, %v303_v12, %v302_v17  ;;  %v293_v48 = vsel %vm239_vm5, %v292_v40, %v291_v52 }
  0xcc   :  { %v265_v28 = vsel %vm264_vm8, %v263_v50, %v248_v19  ;;  %v174_v63 = vpop.xlane.xlu1 %173  ;;  %v306_v60 = vsel %vm235_vm4, %v305_v58, %v304_v16  ;;  %v319_v50 = vld [vmem:[#allocation7] sm:$0xf] }
  0xcd   :  { %v198_v44 = vpop.xlane.xlu2 %197  ;;  %v294_v26 = vperm.slane %v174_v63, %v931_v51  ;;  %583 = vmatpush.msk.msra.mxu1 %vm352_vm11, %v319_v50 }
  0xce   :  { %v195_v8 = vpop.xlane.xlu0 %194  ;;  %v309_v25 = vperm.slane %v198_v44, %v931_v51 }
  0xcf   :  { %v307_v15 = vperm.slane %v195_v8, %v926_v53  ;;  %v295_v47 = vsel %vm243_vm6, %v294_v26, %v293_v48 }
  0xd1   :  { %v308_v46 = vsel %vm239_vm5, %v307_v15, %v306_v60 }
  0xd2   :  { %v310_v53 = vsel %vm243_vm6, %v309_v25, %v308_v46 }
  0xd4   :  { %v201_v34 = vpop.xlane.xlu1 %200 }
  0xd5   :  { %v311_v33 = vperm.slane %v201_v34, %v938_v27 }
  0xd6   :  { %v177_v45 = vpop.xlane.xlu0 %176 }
  0xd7   :  { %v296_v7 = vperm.slane %v177_v45, %v938_v27  ;;  %v312_v51 = vsel %vm247_vm7, %v311_v33, %v310_v53  ;;  %v1059_v27 = vlaneseq }
  0xd9   :  { %v297_v32 = vsel %vm247_vm7, %v296_v7, %v295_v47  ;;  %v401_v18 = vshrl.u32 %v1059_v27, 7 }
  0xda   :  { %v314_v29 = vsel %vm313_vm9, %v312_v51, %v297_v32 }
  0xdb   :  { %v317_v3 = vsel %vm316_vm10, %v265_v28, %v314_v29  ;;  %592 = vset.pattern.permute.xlu2 %v401_v18  ;;  %v414_v61 = vadd.s32 16, %v401_v18  ;;  %v408_v63 = vadd.s32 8, %v401_v18  ;;  %v432_v25 = vadd.s32 40, %v401_v18 }
  0xdc   :  { %582 = vmatmul.msk.f32.vlgmr.msra.gmra.mxu0 %vm320_vm2, %v317_v3  ;;  %v420_v62 = vadd.s32 24, %v401_v18  ;;  %v444_v46 = vadd.s32 56, %v401_v18  ;;  %v426_v24 = vadd.s32 32, %v401_v18  ;;  %v438_v34 = vadd.s32 48, %v401_v18 }
  0xdd   :  { %594 = vset.pattern.permute.xlu1 %v414_v61  ;;  %593 = vset.pattern.permute.xlu0 %v408_v63 }
 0x159   :  { %v344_v19 = vpop.f32.mrf.mxu0 }
 0x15a   :  { %v347_v57 = vmax.f32 %v344_v19, 0.0 }
 0x15c   :  { %584 = vmatmul.msk.f32.vlgmr.msra.gmra.mxu1 %vm348_vm12, %v347_v57 }
 0x1d9   :  { %v373_v12 = vpop.f32.mrf.mxu1 }
 0x1da   :  { %v377_v8 = vrot.slane %v373_v12, 2 }
 0x1dc   :  { %v379_v39 = vadd.f32 %v377_v8, %v373_v12  ;;  %v1060_v12 = vld [vmem:[#allocation12_spill] sm:$0xff] }
 0x1de   :  { %v585_v28 = vmul.f32 -1.442695, %v379_v39  ;;  %v1062_v39 = vld [vmem:[#allocation14_spill] sm:$0xff] }
 0x1e0   :  { %609 = vpow2.f32 %v585_v28 }
 0x1e6   :  { %v610_v23 = vpop.eup %609 }
 0x1e7   :  { %v383_v58 = vadd.f32 1.0, %v610_v23 }
 0x1e9   :  { %611 = vrcp.f32 %v383_v58  ;;  %v395_v44 = vand.u32 2147483648, %v383_v58  ;;  %v393_v49 = vand.u32 2147483647, %v383_v58  ;;  %vm389_vm14 = vweird.f32 %v383_v58 }
 0x1eb   :  { %v396_v22 = vor.u32 1.1754944e-38, %v395_v44  ;;  %vm394_vm0 = vcmp.eq.f32.partialorder %v393_v49, 8.507059e+37  ;;  %v1066_v44 = vld [vmem:[#allocation18_spill] sm:$0xff] }
 0x1ef   :  { %v612_v59 = vpop.eup %611 }
 0x1f0   :  { %v385_v41 = vmul.f32 %v612_v59, %v383_v58  ;;  %vm390_vm13 = vweird.f32 %v612_v59 }
 0x1f1   :  { %vm391_vm15 = vmor %vm389_vm14, %vm390_vm13 }
 0x1f2   :  { %v386_v15 = vsub.f32 1.0, %v385_v41 }
 0x1f4   :  { %v387_v17 = vmul.f32 %v612_v59, %v386_v15 }
 0x1f6   :  { %v388_v16 = vadd.f32 %v612_v59, %v387_v17 }
 0x1f8   :  { %v392_v56 = vsel %vm391_vm15, %v612_v59, %v388_v16  ;;  %v1067_v16 = vld [vmem:[#allocation19_spill] sm:$0xff] }
 0x1f9   :  { %v397_v60 = vsel %vm394_vm0, %v396_v22, %v392_v56  ;;  %v1068_v56 = vld [vmem:[#allocation20_spill] sm:$0xff] }
 0x1fa   :  { %v399_v40 = vperm.slane %v397_v60, 0  ;;  %v448_v26 = vperm.slane %v397_v60, 1 }
 0x1fc   :  { %416 = vperm.xlu1 %594, %v399_v40   ;;  %410 = vperm.xlu0 %593, %v399_v40  }
 0x1fd   :  { %404 = vperm.xlu2 %592, %v399_v40  }
 0x204   :  { %597 = vset.pattern.permute.xlu1 %v432_v25  ;;  %600 = vset.pattern.permute.xlu0 %v401_v18 }
 0x205   :  { %595 = vset.pattern.permute.xlu2 %v420_v62 }
 0x20c   :  { %434 = vperm.xlu1 %597, %v399_v40   ;;  %453 = vperm.xlu0 %600, %v448_v26  }
 0x20d   :  { %422 = vperm.xlu2 %595, %v399_v40  }
 0x214   :  { %599 = vset.pattern.permute.xlu1 %v444_v46  ;;  %605 = vset.pattern.permute.xlu0 %v432_v25 }
 0x215   :  { %596 = vset.pattern.permute.xlu2 %v426_v24 }
 0x21c   :  { %446 = vperm.xlu1 %599, %v399_v40   ;;  %483 = vperm.xlu0 %605, %v448_v26  }
 0x21d   :  { %428 = vperm.xlu2 %596, %v399_v40  }
 0x224   :  { %602 = vset.pattern.permute.xlu1 %v414_v61  ;;  %608 = vset.pattern.permute.xlu0 %v444_v46 }
 0x225   :  { %598 = vset.pattern.permute.xlu2 %v438_v34 }
 0x22c   :  { %465 = vperm.xlu1 %602, %v448_v26  }
 0x22d   :  { %440 = vperm.xlu2 %598, %v399_v40  }
 0x234   :  { %604 = vset.pattern.permute.xlu1 %v426_v24 }
 0x235   :  { %601 = vset.pattern.permute.xlu2 %v408_v63 }
 0x23c   :  { %477 = vperm.xlu1 %604, %v448_v26  }
 0x23d   :  { %459 = vperm.xlu2 %601, %v448_v26  }
 0x244   :  { %607 = vset.pattern.permute.xlu1 %v444_v46 }
 0x245   :  { %603 = vset.pattern.permute.xlu2 %v420_v62 }
 0x24c   :  { %495 = vperm.xlu1 %607, %v448_v26  }
 0x24d   :  { %471 = vperm.xlu2 %603, %v448_v26  }
 0x255   :  { %606 = vset.pattern.permute.xlu2 %v438_v34 }
 0x257   :  { %v405_v52 = vpop.permute.xlu2 %404 }
 0x258   :  { %v497_v33 = vmul.f32 %v405_v52, %v763_v5  ;;  %v498_v45 = vmul.f32 %v405_v52, %v765_v6 }
 0x25a   :  { %529 = vst [vmem:[#allocation8] sm:$0xff] %v497_v33 }
 0x25b   :  { %530 = vst [vmem:[#allocation8 + $0x8] sm:$0xff] %v498_v45 }
 0x25d   :  { %489 = vperm.xlu2 %606, %v448_v26  }
 0x267   :  { %v423_v48 = vpop.permute.xlu2 %422 }
 0x268   :  { %v503_v53 = vmul.f32 %v423_v48, %v793_v20  ;;  %v504_v7 = vmul.f32 %v423_v48, %v795_v21 }
 0x26a   :  { %535 = vst [vmem:[#allocation8 + $0x30] sm:$0xff] %v503_v53 }
 0x26b   :  { %536 = vst [vmem:[#allocation8 + $0x38] sm:$0xff] %v504_v7 }
 0x26e   :  { %v417_v47 = vpop.permute.xlu1 %416  ;;  %v411_v51 = vpop.permute.xlu0 %410 }
 0x26f   :  { %v501_v32 = vmul.f32 %v417_v47, %v757_v2  ;;  %v502_v29 = vmul.f32 %v417_v47, %v761_v4  ;;  %v499_v5 = vmul.f32 %v411_v51, %v779_v13  ;;  %v500_v6 = vmul.f32 %v411_v51, %v781_v14 }
 0x271   :  { %533 = vst [vmem:[#allocation8 + $0x20] sm:$0xff] %v501_v32 }
 0x272   :  { %534 = vst [vmem:[#allocation8 + $0x28] sm:$0xff] %v502_v29 }
 0x273   :  { %531 = vst [vmem:[#allocation8 + $0x10] sm:$0xff] %v499_v5 }
 0x274   :  { %532 = vst [vmem:[#allocation8 + $0x18] sm:$0xff] %v500_v6 }
 0x277   :  { %v429_v3 = vpop.permute.xlu2 %428 }
 0x278   :  { %v505_v20 = vmul.f32 %v429_v3, %v813_v30  ;;  %v506_v21 = vmul.f32 %v429_v3, %v815_v31 }
 0x27a   :  { %537 = vst [vmem:[#allocation8 + $0x40] sm:$0xff] %v505_v20 }
 0x27b   :  { %538 = vst [vmem:[#allocation8 + $0x48] sm:$0xff] %v506_v21 }
 0x27e   :  { %v435_v50 = vpop.permute.xlu1 %434  ;;  %v454_v19 = vpop.permute.xlu0 %453 }
 0x27f   :  { %v507_v2 = vmul.f32 %v435_v50, %v823_v35  ;;  %v508_v4 = vmul.f32 %v435_v50, %v825_v36  ;;  %v513_v13 = vmul.f32 %v454_v19, %v753_v0  ;;  %v514_v14 = vmul.f32 %v454_v19, %v755_v1 }
 0x281   :  { %539 = vst [vmem:[#allocation8 + $0x50] sm:$0xff] %v507_v2 }
 0x282   :  { %540 = vst [vmem:[#allocation8 + $0x58] sm:$0xff] %v508_v4 }
 0x283   :  { %545 = vst [vmem:[#allocation8 + $0x80] sm:$0xff] %v513_v13 }
 0x284   :  { %546 = vst [vmem:[#allocation8 + $0x88] sm:$0xff] %v514_v14 }
 0x287   :  { %v441_v57 = vpop.permute.xlu2 %440 }
 0x288   :  { %v509_v30 = vmul.f32 %v441_v57, %v837_v42  ;;  %v510_v31 = vmul.f32 %v441_v57, %v839_v43 }
 0x28a   :  { %541 = vst [vmem:[#allocation8 + $0x60] sm:$0xff] %v509_v30 }
 0x28b   :  { %542 = vst [vmem:[#allocation8 + $0x68] sm:$0xff] %v510_v31 }
 0x28e   :  { %v447_v27 = vpop.permute.xlu1 %446  ;;  %v484_v18 = vpop.permute.xlu0 %483 }
 0x28f   :  { %v511_v35 = vmul.f32 %v447_v27, %v861_v54  ;;  %v512_v36 = vmul.f32 %v447_v27, %v863_v55  ;;  %v523_v0 = vmul.f32 %v484_v18, %v827_v37  ;;  %v524_v1 = vmul.f32 %v484_v18, %v829_v38  ;;  %v1061_v38 = vld [vmem:[#allocation13_spill] sm:$0xff] }
 0x291   :  { %543 = vst [vmem:[#allocation8 + $0x70] sm:$0xff] %v511_v35 }
 0x292   :  { %544 = vst [vmem:[#allocation8 + $0x78] sm:$0xff] %v512_v36 }
 0x293   :  { %555 = vst [vmem:[#allocation8 + $0xd0] sm:$0xff] %v523_v0 }
 0x294   :  { %556 = vst [vmem:[#allocation8 + $0xd8] sm:$0xff] %v524_v1 }
 0x297   :  { %v460_v61 = vpop.permute.xlu2 %459 }
 0x298   :  { %v515_v42 = vmul.f32 %v460_v61, %v771_v9  ;;  %v516_v43 = vmul.f32 %v460_v61, %v773_v10  ;;  %v1063_v9 = vld [vmem:[#allocation15_spill] sm:$0xff]  ;;  %v1064_v10 = vld [vmem:[#allocation16_spill] sm:$0xff] }
 0x29a   :  { %547 = vst [vmem:[#allocation8 + $0x90] sm:$0xff] %v515_v42 }
 0x29b   :  { %548 = vst [vmem:[#allocation8 + $0x98] sm:$0xff] %v516_v43 }
 0x29e   :  { %v466_v63 = vpop.permute.xlu1 %465 }
 0x29f   :  { %v517_v54 = vmul.f32 %v466_v63, %v775_v11  ;;  %v518_v55 = vmul.f32 %v466_v63, %v1060_v12  ;;  %v1065_v11 = vld [vmem:[#allocation17_spill] sm:$0xff] }
 0x2a1   :  { %549 = vst [vmem:[#allocation8 + $0xa0] sm:$0xff] %v517_v54 }
 0x2a2   :  { %550 = vst [vmem:[#allocation8 + $0xa8] sm:$0xff] %v518_v55 }
 0x2a7   :  { %v472_v37 = vpop.permute.xlu2 %471 }
 0x2a8   :  { %v519_v8 = vmul.f32 %v472_v37, %v1061_v38  ;;  %v520_v28 = vmul.f32 %v472_v37, %v1062_v39 }
 0x2aa   :  { %551 = vst [vmem:[#allocation8 + $0xb0] sm:$0xff] %v519_v8 }
 0x2ab   :  { %552 = vst [vmem:[#allocation8 + $0xb8] sm:$0xff] %v520_v28 }
 0x2ae   :  { %v478_v23 = vpop.permute.xlu1 %477 }
 0x2af   :  { %v521_v58 = vmul.f32 %v478_v23, %v1063_v9  ;;  %v522_v59 = vmul.f32 %v478_v23, %v1064_v10 }
 0x2b1   :  { %553 = vst [vmem:[#allocation8 + $0xc0] sm:$0xff] %v521_v58 }
 0x2b2   :  { %554 = vst [vmem:[#allocation8 + $0xc8] sm:$0xff] %v522_v59 }
 0x2b7   :  { %v490_v41 = vpop.permute.xlu2 %489 }
 0x2b8   :  { %v525_v15 = vmul.f32 %v490_v41, %v1065_v11  ;;  %v526_v17 = vmul.f32 %v490_v41, %v1066_v44 }
 0x2ba   :  { %557 = vst [vmem:[#allocation8 + $0xe0] sm:$0xff] %v525_v15 }
 0x2bb   :  { %558 = vst [vmem:[#allocation8 + $0xe8] sm:$0xff] %v526_v17 }
 0x2be   :  { %v496_v49 = vpop.permute.xlu1 %495 }
 0x2bf   :  { %v527_v22 = vmul.f32 %v496_v49, %v1067_v16  ;;  %v528_v60 = vmul.f32 %v496_v49, %v1068_v56 }
 0x2c1   :  { %559 = vst [vmem:[#allocation8 + $0xf0] sm:$0xff] %v527_v22 }
 0x2c2   :  { %560 = vst [vmem:[#allocation8 + $0xf8] sm:$0xff] %v528_v60 }
 0x2c3   :  { %573 = dma.vmem_to_hbm [thread:$0]  %s566_s2, 4096, %s568_s30, [#allocation4], %s717_s22, %s717_s22, %s718_s23  }
 0x2c4   :  { %713 = dma.done.wait [#allocation4], 4096  }
 0x2c5   :  { %714 = vsyncadd [#allocation4], 4294963200 }
 0x2c6   :  { %578 = vsyncpa [#allocation3], 1 }
 0x2c7   :  { %579 = vsyncpa [#allocation6], 1 }
 0x2c8   :  { %580 = vsyncpa [#allocation4], 1 }

</bundles_post_ra>
